<compile_context>
chip_gen: v7x
topology: tpu7x:2x2x1
jax: 0.10.0
libtpu: 0.0.40
codegen_flags: <defaults>
</compile_context>

<pallas_src>
import math

import jax
import jax.numpy as jnp
from jax.experimental import pallas as pl
from jax.experimental.pallas import tpu as pltpu


def _build_pe(max_seq_len: int, d_model: int) -> jnp.ndarray:
    """Replicates the PyTorch __init__ sinusoidal table, shape (max_seq_len, 1, d_model)."""
    position = jnp.arange(0, max_seq_len, dtype=jnp.float32)[:, None]            # (S, 1)
    div_term = jnp.exp(
        jnp.arange(0, d_model, 2, dtype=jnp.float32) * (-math.log(10000.0) / d_model)
    )                                                                             # (D/2,)
    angles = position * div_term                                                  # (S, D/2)
    pe = jnp.zeros((max_seq_len, d_model), dtype=jnp.float32)
    pe = pe.at[:, 0::2].set(jnp.sin(angles))
    pe = pe.at[:, 1::2].set(jnp.cos(angles))
    return pe[:, None, :]                                                         # (S, 1, D)


def _pe_add_kernel(x_ref, pe_ref, o_ref):
    # x_ref, pe_ref, o_ref: (TS, B*D) lane-dense VMEM tiles.
    o_ref[...] = (x_ref[...] + pe_ref[...]).astype(o_ref.dtype)


def _choose_seq_tile(seq_len: int, row_bytes: int, tile_budget_bytes: int = 2 << 20) -> int:
    """Rows per sequence tile: ~tile_budget per buffer, multiple of 8, capped at S."""
    ts = tile_budget_bytes // max(row_bytes, 1)
    if ts >= seq_len:
        return seq_len                     # full axis — always a legal block dim
    return max(8, (ts // 8) * 8)           # respect the (8, 128) sublane tile


def positional_encoding_forward(x: jnp.ndarray, pe: jnp.ndarray) -> jnp.ndarray:
    """x: (S, B, D); pe: (max_seq_len, 1, D); returns x + pe[:S] (broadcast over B)."""
    S, B, D = x.shape
    assert pe.shape[0] >= S and pe.shape[2] == D

    # Lane-dense 2-D views.  Row s of x2 is [x[s,0,:], x[s,1,:], ...]; replicate
    # the pe row B times along the last axis so the flat add matches the
    # broadcast over the batch dimension.
    x2 = x.reshape(S, B * D)
    pe2 = jnp.tile(pe[:S, 0, :].astype(x.dtype), (1, B))                          # (S, B*D)

    row_bytes = B * D * x.dtype.itemsize
    ts = _choose_seq_tile(S, row_bytes)
    grid = (pl.cdiv(S, ts),)

    nbytes = S * B * D * x.dtype.itemsize
    cost = pl.CostEstimate(
        flops=S * B * D,
        transcendentals=0,
        bytes_accessed=3 * nbytes,         # read x, read tiled pe, write out
    )

    out2 = pl.pallas_call(
        _pe_add_kernel,
        out_shape=jax.ShapeDtypeStruct((S, B * D), x.dtype),
        grid=grid,
        in_specs=[
            pl.BlockSpec((ts, B * D), lambda s: (s, 0)),
            pl.BlockSpec((ts, B * D), lambda s: (s, 0)),
        ],
        out_specs=pl.BlockSpec((ts, B * D), lambda s: (s, 0)),
        compiler_params=pltpu.CompilerParams(
            dimension_semantics=("parallel",),
        ),
        cost_estimate=cost,
    )(x2, pe2)

    return out2.reshape(S, B, D)


if __name__ == "__main__":
    # Small shapes consistent with the module: seq=8, batch=2, d_model=64.
    d_model = 64
    max_seq_len = 16
    seq_len = 8
    batch = 2

    key = jax.random.PRNGKey(0)
    x = jax.random.normal(key, (seq_len, batch, d_model), dtype=jnp.float32)

    pe = _build_pe(max_seq_len, d_model)

    out = positional_encoding_forward(x, pe)
    out = jax.block_until_ready(out)

    # Reference check (plain JAX, same math as the PyTorch forward).
    ref = x + pe[:seq_len, :]
    assert out.shape == (seq_len, batch, d_model)
    assert jnp.allclose(out, ref, atol=1e-6), "mismatch vs reference"

    print("KERNEL_OK")
</pallas_src>

<mosaic_0001>
module attributes {stable_mosaic.version = 11 : i64} {
  func.func @_pe_add_kernel(%arg0: i32, %arg1: memref<8x128xf32, #tpu.memory_space<vmem>>, %arg2: memref<8x128xf32, #tpu.memory_space<vmem>>, %arg3: memref<8x128xf32, #tpu.memory_space<vmem>>) attributes {dimension_semantics = [#tpu.dimension_semantics<parallel>], iteration_bounds = array<i64: 1>, scalar_prefetch = 0 : i64, scratch_operands = 0 : i64, tpu.core_type = #tpu.core_type<tc>, window_params = [{transform_indices = @transform_0, window_bounds = array<i64: 8, 128>}, {transform_indices = @transform_1, window_bounds = array<i64: 8, 128>}, {transform_indices = @transform_2, window_bounds = array<i64: 8, 128>}]} {
    %c0 = arith.constant 0 : index
    %c0_0 = arith.constant 0 : index
    %0 = vector.load %arg1[%c0, %c0_0] : memref<8x128xf32, #tpu.memory_space<vmem>>, vector<8x128xf32>
    %c0_1 = arith.constant 0 : index
    %c0_2 = arith.constant 0 : index
    %1 = vector.load %arg2[%c0_1, %c0_2] : memref<8x128xf32, #tpu.memory_space<vmem>>, vector<8x128xf32>
    %2 = arith.addf %0, %1 : vector<8x128xf32>
    %c0_3 = arith.constant 0 : index
    %c0_4 = arith.constant 0 : index
    %3 = vector.load %arg3[%c0_3, %c0_4] : memref<8x128xf32, #tpu.memory_space<vmem>>, vector<8x128xf32>
    tpu.vector_store %arg3[%c0_3, %c0_4], %2 {strides = array<i32>} : memref<8x128xf32, #tpu.memory_space<vmem>>, vector<8x128xf32>,
    return
  }
  func.func @transform_0(%arg0: i32) -> (i32, i32) {
    %c0_i32 = arith.constant 0 : i32
    %c0_i32_0 = arith.constant 0 : i32
    return %arg0, %c0_i32 : i32, i32
  }
  func.func @transform_1(%arg0: i32) -> (i32, i32) {
    %c0_i32 = arith.constant 0 : i32
    %c0_i32_0 = arith.constant 0 : i32
    return %arg0, %c0_i32 : i32, i32
  }
  func.func @transform_2(%arg0: i32) -> (i32, i32) {
    %c0_i32 = arith.constant 0 : i32
    %c0_i32_0 = arith.constant 0 : i32
    return %arg0, %c0_i32 : i32, i32
  }
}

</mosaic_0001>

<bundles_post_ra>
// kernel: tpu_custom_call.1
= control target key start
LH: loop header
LB: loop body
LE: loop exit
PB: predicated region body
PF: predicated region fallthrough
CT: control target
= control target key end

     0   :  { %7 = vsyncpa [#allocation3], 0  ;;  %s185_s0 = inlined_call_operand.hbm [shape: f32[8,128], index: 0, kind: input, shape index: {}]   ;;  %s186_s1 = inlined_call_operand.hbm [shape: f32[8,128], index: 1, kind: input, shape index: {}]   ;;  %s187_s2 = inlined_call_operand.hbm [shape: f32[8,128], index: 2, kind: output, shape index: {}]  }
   0x1   :  { %8 = vsyncpa [#allocation6], 0 }
   0x2   :  { %9 = vsyncpa [#allocation4], 0  ;;  %s131_s9 = smov [#allocation2]   ;;  %s132_s11 = smov [#allocation5]  }
   0x3   :  { %s16_s10 = sshll.u32 %s131_s9, 4  ;;  %s26_s12 = sshll.u32 %s132_s11, 4  ;;  %s17_s10 = int_to_ptr.vmem [resolvable:$true] %s16_s10  ;;  %s27_s12 = int_to_ptr.vmem [resolvable:$true] %s26_s12 }
   0x4   :  { %s59_s15 = scalar_lea.hbm %s185_s0, 128 }
   0x5   :  { %p60_p0 = scmp.ne.s32.totalorder %s185_s0, %s59_s15  ;;  %p63_p1 = scmp.lt.u32.totalorder %s59_s15, %s185_s0 }
   0x7   :  { %p65_p2 = pnand %p63_p1, %p60_p0 }
   0x9   :  { %68 = shalt.err (!%p65_p2)
}
   0xa   :  { %s69_s20 = scalar_lea.vmem %s17_s10, 128  ;;  %p74_p4 = scmp.lt.s32.totalorder %s17_s10, %s17_s10 }
   0xb   :  { %p70_p3 = scmp.ne.s32.totalorder %s17_s10, %s69_s20  ;;  %p75_p5 = scmp.lt.s32.totalorder %s69_s20, %s69_s20 }
   0xd   :  { %p76_p6 = por %p75_p5, %p74_p4 }
   0xf   :  { %p77_p7 = pnand %p76_p6, %p70_p3 }
  0x11   :  { %80 = shalt.err (!%p77_p7)
}
  0x12   :  { %19 = dma.hbm_to_vmem [thread:$0]  %s185_s0, 128, %s17_s10, [#allocation3]  }
  0x13   :  { %s81_s25 = scalar_lea.hbm %s186_s1, 128 }
  0x14   :  { %p82_p8 = scmp.ne.s32.totalorder %s186_s1, %s81_s25  ;;  %p85_p9 = scmp.lt.u32.totalorder %s81_s25, %s186_s1 }
  0x16   :  { %p87_p10 = pnand %p85_p9, %p82_p8 }
  0x18   :  { %90 = shalt.err (!%p87_p10)
}
  0x19   :  { %s91_s30 = scalar_lea.vmem %s27_s12, 128  ;;  %p96_p12 = scmp.lt.s32.totalorder %s27_s12, %s27_s12 }
  0x1a   :  { %p92_p11 = scmp.ne.s32.totalorder %s27_s12, %s91_s30  ;;  %p97_p13 = scmp.lt.s32.totalorder %s91_s30, %s91_s30 }
  0x1c   :  { %p98_p0 = por %p97_p13, %p96_p12 }
  0x1e   :  { %p99_p1 = pnand %p98_p0, %p92_p11 }
  0x20   :  { %102 = shalt.err (!%p99_p1)
}
  0x21   :  { %29 = dma.hbm_to_vmem [thread:$0]  %s186_s1, 128, %s27_s12, [#allocation6]  }
  0x22   :  { %125 = dma.done.wait [#allocation3], 128  }
  0x23   :  { %126 = vsyncadd [#allocation3], 4294967168 }
  0x24   :  { %127 = dma.done.wait [#allocation6], 128  }
  0x25   :  { %128 = vsyncadd [#allocation6], 4294967168  ;;  %s133_s4 = smov [#allocation7]   ;;  %v36_v0 = vld [vmem:[#allocation2] sm:$0xff]  ;;  %v37_v1 = vld [vmem:[#allocation5] sm:$0xff] }
  0x26   :  { %s46_s5 = sshll.u32 %s133_s4, 4  ;;  %v38_v2 = vadd.f32 %v37_v1, %v36_v0  ;;  %s47_s5 = int_to_ptr.vmem [resolvable:$true] %s46_s5 }
  0x27   :  { %s103_s6 = scalar_lea.vmem %s47_s5, 128  ;;  %p108_p3 = scmp.lt.s32.totalorder %s47_s5, %s47_s5 }
  0x28   :  { %39 = vst [vmem:[#allocation7] sm:$0xff] %v38_v2  ;;  %p104_p2 = scmp.ne.s32.totalorder %s47_s5, %s103_s6  ;;  %p109_p4 = scmp.lt.s32.totalorder %s103_s6, %s103_s6 }
  0x2a   :  { %p110_p5 = por %p109_p4, %p108_p3 }
  0x2c   :  { %p111_p6 = pnand %p110_p5, %p104_p2 }
  0x2e   :  { %114 = shalt.err (!%p111_p6)
}
  0x2f   :  { %s115_s8 = scalar_lea.hbm %s187_s2, 128 }
  0x30   :  { %p116_p7 = scmp.ne.s32.totalorder %s187_s2, %s115_s8  ;;  %p119_p8 = scmp.lt.u32.totalorder %s115_s8, %s187_s2 }
  0x32   :  { %p121_p9 = pnand %p119_p8, %p116_p7 }
  0x34   :  { %124 = shalt.err (!%p121_p9)
}
  0x35   :  { %49 = dma.vmem_to_hbm [thread:$0]  %s47_s5, 128, %s187_s2, [#allocation4]  }
  0x36   :  { %129 = dma.done.wait [#allocation4], 128  }
  0x37   :  { %130 = vsyncadd [#allocation4], 4294967168 }
  0x38   :  { %53 = vsyncpa [#allocation3], 1 }
  0x39   :  { %54 = vsyncpa [#allocation6], 1 }
  0x3a   :  { %55 = vsyncpa [#allocation4], 1 }

</bundles_post_ra>
